<compile_context>
chip_gen: v5e
topology: v5e:2x2
jax: 0.10.0
libtpu: 0.0.40
codegen_flags: <defaults>
</compile_context>

<pallas_src>
import functools

import numpy as np
import jax
import jax.numpy as jnp
from jax.experimental import pallas as pl
from jax.experimental.pallas import tpu as pltpu

LANE = 128
MAX_TILE_N = 2048   # row tile for aggregation (big: amortizes XW re-reads + step overhead)
MAX_TILE_K = 512    # reduction tile over source nodes


def _round_up(x, m):
    return (x + m - 1) // m * m


def _pick_tile(n_pad, max_tile):
    """Largest multiple of LANE that divides n_pad and is <= max_tile."""
    best = LANE
    t = LANE
    top = min(max_tile, n_pad)
    while t <= top:
        if n_pad % t == 0:
            best = t
        t += LANE
    return best


def _vmem_budget_bytes():
    """Scoped-VMEM budget from the actual chip (v7x: 64 MiB/TC, v5e/v6e: 128 MiB)."""
    try:
        cap = int(pltpu.get_tpu_info().vmem_capacity_bytes)
    except Exception:
        cap = 64 * 1024 * 1024  # conservative (v7x) fallback
    return max(32 * 1024 * 1024, min(cap * 3 // 4, 100 * 1024 * 1024))


# ---------------------------------------------------------------------------
# Fused small-graph layer:  out = A_hat @ (X @ W) + b   in one pallas_call.
# X, W resident; XW computed once (grid step 0) into a persistent VMEM scratch.
# ---------------------------------------------------------------------------
def fused_layer_kernel(x_ref, w_ref, a_ref, b_ref, o_ref, xw_ref, *, apply_relu):
    @pl.when(pl.program_id(0) == 0)
    def _():
        xw_ref[...] = jnp.dot(
            x_ref[...], w_ref[...], preferred_element_type=jnp.float32
        ).astype(xw_ref.dtype)

    h = jnp.dot(a_ref[...], xw_ref[...], preferred_element_type=jnp.float32)
    h = h + b_ref[...]
    if apply_relu:
        h = jnp.maximum(h, 0.0)
    o_ref[...] = h.astype(o_ref.dtype)


def fused_gcn_layer(x, w, a_hat, b, *, apply_relu, out_dtype, tile_n, vmem_limit):
    n_pad, f_in = x.shape
    f_out = w.shape[1]
    return pl.pallas_call(
        functools.partial(fused_layer_kernel, apply_relu=apply_relu),
        out_shape=jax.ShapeDtypeStruct((n_pad, f_out), out_dtype),
        grid_spec=pltpu.PrefetchScalarGridSpec(
            num_scalar_prefetch=0,
            grid=(n_pad // tile_n,),
            in_specs=[
                pl.BlockSpec((n_pad, f_in), lambda i: (0, 0)),    # X resident
                pl.BlockSpec((f_in, f_out), lambda i: (0, 0)),    # W resident
                pl.BlockSpec((tile_n, n_pad), lambda i: (i, 0)),  # A_hat row slab
                pl.BlockSpec((1, f_out), lambda i: (0, 0)),       # bias
            ],
            out_specs=pl.BlockSpec((tile_n, f_out), lambda i: (i, 0)),
            scratch_shapes=[pltpu.VMEM((n_pad, f_out), jnp.bfloat16)],  # XW, persists
        ),
        compiler_params=pltpu.CompilerParams(
            # XW scratch is written at i==0 and reused later -> keep sequential.
            dimension_semantics=("arbitrary",),
            vmem_limit_bytes=vmem_limit,
        ),
    )(x, w, a_hat, b)


# ---------------------------------------------------------------------------
# Streaming kernel 1: feature transform  XW = X @ W   (bf16 x bf16, bf16 out)
# ---------------------------------------------------------------------------
def xw_kernel(x_ref, w_ref, o_ref):
    o_ref[...] = jnp.dot(
        x_ref[...], w_ref[...], preferred_element_type=jnp.float32
    ).astype(o_ref.dtype)


def feature_transform(x, w, *, tile_n, vmem_limit):
    n_pad, f_in = x.shape
    f_out = w.shape[1]
    return pl.pallas_call(
        xw_kernel,
        out_shape=jax.ShapeDtypeStruct((n_pad, f_out), jnp.bfloat16),
        grid_spec=pltpu.PrefetchScalarGridSpec(
            num_scalar_prefetch=0,
            grid=(n_pad // tile_n,),
            in_specs=[
                pl.BlockSpec((tile_n, f_in), lambda i: (i, 0)),   # row tile of X
                pl.BlockSpec((f_in, f_out), lambda i: (0, 0)),    # full W
            ],
            out_specs=pl.BlockSpec((tile_n, f_out), lambda i: (i, 0)),
        ),
        compiler_params=pltpu.CompilerParams(
            dimension_semantics=("parallel",),
            vmem_limit_bytes=vmem_limit,
        ),
    )(x, w)


# ---------------------------------------------------------------------------
# Streaming kernel 2: aggregation  H = A_hat @ XW + b  [+ ReLU]
#   grid = (rows, K); bf16 operands, f32 accumulation in VMEM scratch.
# ---------------------------------------------------------------------------
def agg_kernel(a_ref, xw_ref, b_ref, o_ref, acc_ref, *, apply_relu):
    k = pl.program_id(1)

    @pl.when(k == 0)
    def _():
        acc_ref[...] = jnp.zeros_like(acc_ref)

    acc_ref[...] += jnp.dot(
        a_ref[...], xw_ref[...], preferred_element_type=jnp.float32
    )

    @pl.when(k == pl.num_programs(1) - 1)
    def _():
        h = acc_ref[...] + b_ref[...]
        if apply_relu:
            h = jnp.maximum(h, 0.0)
        o_ref[...] = h.astype(o_ref.dtype)


def aggregate(a_hat, xw, b, *, apply_relu, out_dtype, tile_n, tile_k, vmem_limit):
    n_pad = a_hat.shape[0]
    f_out = xw.shape[1]
    return pl.pallas_call(
        functools.partial(agg_kernel, apply_relu=apply_relu),
        out_shape=jax.ShapeDtypeStruct((n_pad, f_out), out_dtype),
        grid_spec=pltpu.PrefetchScalarGridSpec(
            num_scalar_prefetch=0,
            grid=(n_pad // tile_n, n_pad // tile_k),
            in_specs=[
                pl.BlockSpec((tile_n, tile_k), lambda i, k: (i, k)),   # A_hat tile
                pl.BlockSpec((tile_k, f_out), lambda i, k: (k, 0)),    # XW K-slice
                pl.BlockSpec((1, f_out), lambda i, k: (0, 0)),         # bias
            ],
            out_specs=pl.BlockSpec((tile_n, f_out), lambda i, k: (i, 0)),
            scratch_shapes=[pltpu.VMEM((tile_n, f_out), jnp.float32)],
        ),
        compiler_params=pltpu.CompilerParams(
            dimension_semantics=("parallel", "arbitrary"),
            vmem_limit_bytes=vmem_limit,
        ),
    )(a_hat, xw, b)


# ---------------------------------------------------------------------------
# GCN symmetric normalization  A_hat = D^{-1/2} (A + I) D^{-1/2}
# Dense, built once outside the kernels; matches GCNConv(add_self_loops=True).
# Stored bf16 (halves the binding A_hat HBM stream), zero-padded to n_pad.
# ---------------------------------------------------------------------------
def build_gcn_norm_adj(edge_index, num_nodes, n_pad):
    src, dst = edge_index[0], edge_index[1]
    loops = jnp.arange(num_nodes, dtype=edge_index.dtype)
    src = jnp.concatenate([src, loops])
    dst = jnp.concatenate([dst, loops])
    ones = jnp.ones(src.shape[0], dtype=jnp.float32)
    deg = jnp.zeros((num_nodes,), jnp.float32).at[dst].add(ones)
    dinv = jnp.where(deg > 0, jax.lax.rsqrt(deg), 0.0)
    vals = dinv[dst] * dinv[src]
    a_hat = jnp.zeros((num_nodes, num_nodes), jnp.float32).at[dst, src].add(vals)
    pad = n_pad - num_nodes
    a_hat = jnp.pad(a_hat, ((0, pad), (0, pad)))
    return a_hat.astype(jnp.bfloat16)


# ---------------------------------------------------------------------------
# GNN module equivalent
# ---------------------------------------------------------------------------
def glorot(key, fan_in, fan_out):
    limit = jnp.sqrt(6.0 / (fan_in + fan_out))
    return jax.random.uniform(key, (fan_in, fan_out), jnp.float32, -limit, limit)


def init_gnn_params(key, feature, hidden, output):
    dims = [feature] + list(hidden) + [output]
    params = []
    for i in range(len(dims) - 1):
        key, wk = jax.random.split(key)
        w = glorot(wk, dims[i], dims[i + 1])
        b = jnp.zeros((dims[i + 1],), jnp.float32)
        params.append((w, b))
    return params


def gnn_forward(params, x, edge_index, *, force_streaming=False):
    """GCNConv -> ReLU -> Dropout(eval) over hidden layers, then final GCNConv."""
    # TODO(synk): Dropout(0.5) is stochastic in training mode; implemented here as
    # identity (eval-mode semantics).
    n, f_in = x.shape
    n_pad = _round_up(n, LANE)          # pad only to 128 (A_hat bytes ~ n_pad^2)

    a_hat = build_gcn_norm_adj(edge_index, n, n_pad)        # bf16 [n_pad, n_pad]

    f_in_pad = _round_up(f_in, LANE)
    h = jnp.pad(x, ((0, n_pad - n), (0, f_in_pad - f_in))).astype(jnp.bfloat16)

    vmem_limit = _vmem_budget_bytes()
    out_dim = params[-1][1].shape[0]

    for i, (w, b) in enumerate(params):
        is_last = i == len(params) - 1
        fi, fo = w.shape
        fi_p, fo_p = _round_up(fi, LANE), _round_up(fo, LANE)
        w_p = jnp.pad(w, ((0, fi_p - fi), (0, fo_p - fo))).astype(jnp.bfloat16)
        b_p = jnp.pad(b, (0, fo_p - fo)).reshape(1, fo_p)    # f32 bias
        out_dtype = jnp.float32 if is_last else jnp.bfloat16

        # Rough VMEM footprint of the fused path (bf16 operands, double-buffered
        # A_hat / output worst case) -> fuse only when it fits comfortably.
        fused_bytes = (
            2 * n_pad * fi_p                 # X resident
            + 2 * fi_p * fo_p                # W resident
            + 2 * 2 * n_pad * n_pad          # A_hat slabs (worst case full, x2)
            + 2 * n_pad * fo_p               # XW scratch
            + 2 * 4 * n_pad * fo_p           # output tiles (<= f32), x2
        )

        if (not force_streaming) and fused_bytes <= vmem_limit // 2:
            tile_n = _pick_tile(n_pad, MAX_TILE_N)
            h = fused_gcn_layer(h, w_p, a_hat, b_p, apply_relu=not is_last,
                                out_dtype=out_dtype, tile_n=tile_n,
                                vmem_limit=vmem_limit)
        else:
            tile_n = _pick_tile(n_pad, MAX_TILE_N)
            tile_k = _pick_tile(n_pad, MAX_TILE_K)
            xw = feature_transform(h, w_p, tile_n=tile_n, vmem_limit=vmem_limit)
            h = aggregate(a_hat, xw, b_p, apply_relu=not is_last,
                          out_dtype=out_dtype, tile_n=tile_n, tile_k=tile_k,
                          vmem_limit=vmem_limit)

    return h[:n, :out_dim]


# Pure-JAX f32 reference (matches the PyTorch GCNConv stack semantics).
def gnn_reference(params, x, edge_index):
    n = x.shape[0]
    src, dst = edge_index[0], edge_index[1]
    loops = jnp.arange(n, dtype=edge_index.dtype)
    src = jnp.concatenate([src, loops])
    dst = jnp.concatenate([dst, loops])
    ones = jnp.ones(src.shape[0], jnp.float32)
    deg = jnp.zeros((n,), jnp.float32).at[dst].add(ones)
    dinv = jnp.where(deg > 0, jax.lax.rsqrt(deg), 0.0)
    a = jnp.zeros((n, n), jnp.float32).at[dst, src].add(dinv[dst] * dinv[src])
    h = x
    for i, (w, b) in enumerate(params):
        h = a @ (h @ w) + b
        if i != len(params) - 1:
            h = jnp.maximum(h, 0.0)
    return h


if __name__ == "__main__":
    # Small shapes consistent with GNN(conv="GCNConv", feature, hidden, output)
    N = 128          # number of nodes
    E = 512          # number of edges
    FEATURE = 16
    HIDDEN = [32, 32]
    OUTPUT = 8

    key = jax.random.PRNGKey(0)
    kx, ksrc, kdst, kp = jax.random.split(key, 4)

    x = jax.random.normal(kx, (N, FEATURE), jnp.float32)
    edge_index = jnp.stack([
        jax.random.randint(ksrc, (E,), 0, N, dtype=jnp.int32),
        jax.random.randint(kdst, (E,), 0, N, dtype=jnp.int32),
    ])  # [2, E]

    params = init_gnn_params(kp, FEATURE, HIDDEN, OUTPUT)

    fwd_fused = jax.jit(gnn_forward)
    fwd_stream = jax.jit(functools.partial(gnn_forward, force_streaming=True))

    out_fused = jax.block_until_ready(fwd_fused(params, x, edge_index))
    out_stream = jax.block_until_ready(fwd_stream(params, x, edge_index))
    ref = np.asarray(gnn_reference(params, x, edge_index))

    assert out_fused.shape == (N, OUTPUT), out_fused.shape
    assert out_stream.shape == (N, OUTPUT), out_stream.shape
    # bf16 A_hat / XW / activations => ~1e-2 relative error vs f32 PyTorch (inference OK).
    assert np.allclose(np.asarray(out_fused), ref, rtol=0.1, atol=0.1)
    assert np.allclose(np.asarray(out_stream), ref, rtol=0.1, atol=0.1)
    print("KERNEL_OK")
</pallas_src>

<mosaic_0001>
module attributes {stable_mosaic.version = 11 : i64} {
  func.func @fused_layer_kernel(%arg0: i32, %arg1: memref<128x128xbf16, #tpu.memory_space<vmem>>, %arg2: memref<128x128xbf16, #tpu.memory_space<vmem>>, %arg3: memref<128x128xbf16, #tpu.memory_space<vmem>>, %arg4: memref<1x128xf32, #tpu.memory_space<vmem>>, %arg5: memref<128x128xbf16, #tpu.memory_space<vmem>>, %arg6: memref<128x128xbf16, #tpu.memory_space<vmem>>) attributes {dimension_semantics = [#tpu.dimension_semantics<arbitrary>], iteration_bounds = array<i64: 1>, scalar_prefetch = 0 : i64, scratch_operands = 1 : i64, tpu.core_type = #tpu.core_type<tc>, window_params = [{pipeline_mode = #tpu.pipeline_mode<synchronous>, transform_indices = @transform_0, window_bounds = array<i64: 128, 128>}, {pipeline_mode = #tpu.pipeline_mode<synchronous>, transform_indices = @transform_1, window_bounds = array<i64: 128, 128>}, {transform_indices = @transform_2, window_bounds = array<i64: 128, 128>}, {pipeline_mode = #tpu.pipeline_mode<synchronous>, transform_indices = @transform_3, window_bounds = array<i64: 1, 128>}, {transform_indices = @transform_4, window_bounds = array<i64: 128, 128>}]} {
    %c0_i32 = arith.constant 0 : i32
    %0 = arith.cmpi eq, %arg0, %c0_i32 : i32
    %1 = arith.extui %0 : i1 to i32
    %c0_i32_0 = arith.constant 0 : i32
    %2 = arith.cmpi ne, %1, %c0_i32_0 : i32
    scf.if %2 {
      %c0_9 = arith.constant 0 : index
      %c0_10 = arith.constant 0 : index
      %13 = vector.load %arg1[%c0_9, %c0_10] : memref<128x128xbf16, #tpu.memory_space<vmem>>, vector<128x128xbf16>
      %c0_11 = arith.constant 0 : index
      %c0_12 = arith.constant 0 : index
      %14 = vector.load %arg2[%c0_11, %c0_12] : memref<128x128xbf16, #tpu.memory_space<vmem>>, vector<128x128xbf16>
      %cst_13 = arith.constant dense<0.000000e+00> : vector<128x128xf32>
      %15 = tpu.matmul %13, %14, %cst_13 {dimension_numbers = #tpu.dot_dimension_numbers<[1], [0], [0], [1], [0, 0, 1, 1], [], []>} : vector<128x128xbf16>, vector<128x128xbf16>, vector<128x128xf32> -> vector<128x128xf32>
      %16 = arith.truncf %15 : vector<128x128xf32> to vector<128x128xbf16>
      %c0_14 = arith.constant 0 : index
      %c0_15 = arith.constant 0 : index
      %17 = vector.load %arg6[%c0_14, %c0_15] : memref<128x128xbf16, #tpu.memory_space<vmem>>, vector<128x128xbf16>
      tpu.vector_store %arg6[%c0_14, %c0_15], %16 {strides = array<i32>} : memref<128x128xbf16, #tpu.memory_space<vmem>>, vector<128x128xbf16>,
    } else {
    }
    %c0 = arith.constant 0 : index
    %c0_1 = arith.constant 0 : index
    %3 = vector.load %arg3[%c0, %c0_1] : memref<128x128xbf16, #tpu.memory_space<vmem>>, vector<128x128xbf16>
    %c0_2 = arith.constant 0 : index
    %c0_3 = arith.constant 0 : index
    %4 = vector.load %arg6[%c0_2, %c0_3] : memref<128x128xbf16, #tpu.memory_space<vmem>>, vector<128x128xbf16>
    %cst = arith.constant dense<0.000000e+00> : vector<128x128xf32>
    %5 = tpu.matmul %3, %4, %cst {dimension_numbers = #tpu.dot_dimension_numbers<[1], [0], [0], [1], [0, 0, 1, 1], [], []>} : vector<128x128xbf16>, vector<128x128xbf16>, vector<128x128xf32> -> vector<128x128xf32>
    %c0_4 = arith.constant 0 : index
    %c0_5 = arith.constant 0 : index
    %6 = vector.load %arg4[%c0_4, %c0_5] : memref<1x128xf32, #tpu.memory_space<vmem>>, vector<1x128xf32>
    %7 = vector.broadcast %6 : vector<1x128xf32> to vector<128x128xf32>
    %8 = arith.addf %5, %7 : vector<128x128xf32>
    %cst_6 = arith.constant 0.000000e+00 : f32
    %9 = vector.broadcast %cst_6 : f32 to vector<128x128xf32>
    %10 = arith.maximumf %8, %9 : vector<128x128xf32>
    %11 = arith.truncf %10 : vector<128x128xf32> to vector<128x128xbf16>
    %c0_7 = arith.constant 0 : index
    %c0_8 = arith.constant 0 : index
    %12 = vector.load %arg5[%c0_7, %c0_8] : memref<128x128xbf16, #tpu.memory_space<vmem>>, vector<128x128xbf16>
    tpu.vector_store %arg5[%c0_7, %c0_8], %11 {strides = array<i32>} : memref<128x128xbf16, #tpu.memory_space<vmem>>, vector<128x128xbf16>,
    return
  }
  func.func @transform_0(%arg0: i32) -> (i32, i32) {
    %c0_i32 = arith.constant 0 : i32
    %c0_i32_0 = arith.constant 0 : i32
    %c0_i32_1 = arith.constant 0 : i32
    return %c0_i32, %c0_i32_0 : i32, i32
  }
  func.func @transform_1(%arg0: i32) -> (i32, i32) {
    %c0_i32 = arith.constant 0 : i32
    %c0_i32_0 = arith.constant 0 : i32
    %c0_i32_1 = arith.constant 0 : i32
    return %c0_i32, %c0_i32_0 : i32, i32
  }
  func.func @transform_2(%arg0: i32) -> (i32, i32) {
    %c0_i32 = arith.constant 0 : i32
    %c0_i32_0 = arith.constant 0 : i32
    return %arg0, %c0_i32 : i32, i32
  }
  func.func @transform_3(%arg0: i32) -> (i32, i32) {
    %c0_i32 = arith.constant 0 : i32
    %c0_i32_0 = arith.constant 0 : i32
    %c0_i32_1 = arith.constant 0 : i32
    return %c0_i32, %c0_i32_0 : i32, i32
  }
  func.func @transform_4(%arg0: i32) -> (i32, i32) {
    %c0_i32 = arith.constant 0 : i32
    %c0_i32_0 = arith.constant 0 : i32
    return %arg0, %c0_i32 : i32, i32
  }
}

module attributes {stable_mosaic.version = 11 : i64} {
  func.func @fused_layer_kernel(%arg0: i32, %arg1: memref<128x128xbf16, #tpu.memory_space<vmem>>, %arg2: memref<128x128xbf16, #tpu.memory_space<vmem>>, %arg3: memref<128x128xbf16, #tpu.memory_space<vmem>>, %arg4: memref<1x128xf32, #tpu.memory_space<vmem>>, %arg5: memref<128x128xf32, #tpu.memory_space<vmem>>, %arg6: memref<128x128xbf16, #tpu.memory_space<vmem>>) attributes {dimension_semantics = [#tpu.dimension_semantics<arbitrary>], iteration_bounds = array<i64: 1>, scalar_prefetch = 0 : i64, scratch_operands = 1 : i64, tpu.core_type = #tpu.core_type<tc>, window_params = [{pipeline_mode = #tpu.pipeline_mode<synchronous>, transform_indices = @transform_0, window_bounds = array<i64: 128, 128>}, {pipeline_mode = #tpu.pipeline_mode<synchronous>, transform_indices = @transform_1, window_bounds = array<i64: 128, 128>}, {transform_indices = @transform_2, window_bounds = array<i64: 128, 128>}, {pipeline_mode = #tpu.pipeline_mode<synchronous>, transform_indices = @transform_3, window_bounds = array<i64: 1, 128>}, {transform_indices = @transform_4, window_bounds = array<i64: 128, 128>}]} {
    %c0_i32 = arith.constant 0 : i32
    %0 = arith.cmpi eq, %arg0, %c0_i32 : i32
    %1 = arith.extui %0 : i1 to i32
    %c0_i32_0 = arith.constant 0 : i32
    %2 = arith.cmpi ne, %1, %c0_i32_0 : i32
    scf.if %2 {
      %c0_8 = arith.constant 0 : index
      %c0_9 = arith.constant 0 : index
      %10 = vector.load %arg1[%c0_8, %c0_9] : memref<128x128xbf16, #tpu.memory_space<vmem>>, vector<128x128xbf16>
      %c0_10 = arith.constant 0 : index
      %c0_11 = arith.constant 0 : index
      %11 = vector.load %arg2[%c0_10, %c0_11] : memref<128x128xbf16, #tpu.memory_space<vmem>>, vector<128x128xbf16>
      %cst_12 = arith.constant dense<0.000000e+00> : vector<128x128xf32>
      %12 = tpu.matmul %10, %11, %cst_12 {dimension_numbers = #tpu.dot_dimension_numbers<[1], [0], [0], [1], [0, 0, 1, 1], [], []>} : vector<128x128xbf16>, vector<128x128xbf16>, vector<128x128xf32> -> vector<128x128xf32>
      %13 = arith.truncf %12 : vector<128x128xf32> to vector<128x128xbf16>
      %c0_13 = arith.constant 0 : index
      %c0_14 = arith.constant 0 : index
      %14 = vector.load %arg6[%c0_13, %c0_14] : memref<128x128xbf16, #tpu.memory_space<vmem>>, vector<128x128xbf16>
      tpu.vector_store %arg6[%c0_13, %c0_14], %13 {strides = array<i32>} : memref<128x128xbf16, #tpu.memory_space<vmem>>, vector<128x128xbf16>,
    } else {
    }
    %c0 = arith.constant 0 : index
    %c0_1 = arith.constant 0 : index
    %3 = vector.load %arg3[%c0, %c0_1] : memref<128x128xbf16, #tpu.memory_space<vmem>>, vector<128x128xbf16>
    %c0_2 = arith.constant 0 : index
    %c0_3 = arith.constant 0 : index
    %4 = vector.load %arg6[%c0_2, %c0_3] : memref<128x128xbf16, #tpu.memory_space<vmem>>, vector<128x128xbf16>
    %cst = arith.constant dense<0.000000e+00> : vector<128x128xf32>
    %5 = tpu.matmul %3, %4, %cst {dimension_numbers = #tpu.dot_dimension_numbers<[1], [0], [0], [1], [0, 0, 1, 1], [], []>} : vector<128x128xbf16>, vector<128x128xbf16>, vector<128x128xf32> -> vector<128x128xf32>
    %c0_4 = arith.constant 0 : index
    %c0_5 = arith.constant 0 : index
    %6 = vector.load %arg4[%c0_4, %c0_5] : memref<1x128xf32, #tpu.memory_space<vmem>>, vector<1x128xf32>
    %7 = vector.broadcast %6 : vector<1x128xf32> to vector<128x128xf32>
    %8 = arith.addf %5, %7 : vector<128x128xf32>
    %c0_6 = arith.constant 0 : index
    %c0_7 = arith.constant 0 : index
    %9 = vector.load %arg5[%c0_6, %c0_7] : memref<128x128xf32, #tpu.memory_space<vmem>>, vector<128x128xf32>
    tpu.vector_store %arg5[%c0_6, %c0_7], %8 {strides = array<i32>} : memref<128x128xf32, #tpu.memory_space<vmem>>, vector<128x128xf32>,
    return
  }
  func.func @transform_0(%arg0: i32) -> (i32, i32) {
    %c0_i32 = arith.constant 0 : i32
    %c0_i32_0 = arith.constant 0 : i32
    %c0_i32_1 = arith.constant 0 : i32
    return %c0_i32, %c0_i32_0 : i32, i32
  }
  func.func @transform_1(%arg0: i32) -> (i32, i32) {
    %c0_i32 = arith.constant 0 : i32
    %c0_i32_0 = arith.constant 0 : i32
    %c0_i32_1 = arith.constant 0 : i32
    return %c0_i32, %c0_i32_0 : i32, i32
  }
  func.func @transform_2(%arg0: i32) -> (i32, i32) {
    %c0_i32 = arith.constant 0 : i32
    %c0_i32_0 = arith.constant 0 : i32
    return %arg0, %c0_i32 : i32, i32
  }
  func.func @transform_3(%arg0: i32) -> (i32, i32) {
    %c0_i32 = arith.constant 0 : i32
    %c0_i32_0 = arith.constant 0 : i32
    %c0_i32_1 = arith.constant 0 : i32
    return %c0_i32, %c0_i32_0 : i32, i32
  }
  func.func @transform_4(%arg0: i32) -> (i32, i32) {
    %c0_i32 = arith.constant 0 : i32
    %c0_i32_0 = arith.constant 0 : i32
    return %arg0, %c0_i32 : i32, i32
  }
}

</mosaic_0001>

<bundles_post_ra>
// kernel: mul.1
= control target key start
LH: loop header
LB: loop body
LE: loop exit
PB: predicated region body
PF: predicated region fallthrough
CT: control target
= control target key end

     0   :  { %s34_s0 = inlined_call_operand.vmem [shape: f32[640], index: 0, kind: input, shape index: {}]   ;;  %s35_s1 = inlined_call_operand.vmem [shape: f32[640], index: 1, kind: input, shape index: {}]   ;;  %s36_s2 = inlined_call_operand.vmem [shape: f32[640], index: 2, kind: output, shape index: {}]  }
   0x1   :  { %v3_v0 = vld [vmem:[%s34_s0] sm:$0x1f] }
   0x2   :  { %v4_v1 = vld [vmem:[%s35_s1] sm:$0x1f] }
   0x3   :  { %v7_v2 = vmul.f32 %v4_v1, %v3_v0 }
   0x5   :  { %9 = vst [vmem:[%s36_s2] sm:$0xff] %v7_v2 }

// kernel: gnn_forward.3
= control target key start
LH: loop header
LB: loop body
LE: loop exit
PB: predicated region body
PF: predicated region fallthrough
CT: control target
= control target key end

     0   :  { %s858_s1 = inlined_call_operand.vmem [shape: bf16[128,128], index: 1, kind: input, shape index: {}]   ;;  %s859_s0 = inlined_call_operand.vmem [shape: bf16[128,128], index: 0, kind: input, shape index: {}]   ;;  %s860_s3 = inlined_call_operand.vmem [shape: f32[1,128], index: 3, kind: input, shape index: {}]   ;;  %s861_s2 = inlined_call_operand.vmem [shape: bf16[128,128], index: 2, kind: input, shape index: {}]   ;;  %s862_s4 = inlined_call_operand.vmem [shape: bf16[128,128], index: 4, kind: output, shape index: {}]  }
   0x1   :  { %v606_v0 = vld [vmem:[%s858_s1 + $0x38] sm:$0xff]  ;;  %v605_v1 = vld [vmem:[%s858_s1 + $0x30] sm:$0xff]  ;;  %v604_v2 = vld [vmem:[%s858_s1 + $0x28] sm:$0xff] }
   0x2   :  { %717 = vmatpush.bf16.msra.mxu2 %v606_v0  ;;  %149 = vmatpush.bf16.msra.mxu0 %v606_v0  ;;  %v603_v3 = vld [vmem:[%s858_s1 + $0x20] sm:$0xff]  ;;  %v602_v4 = vld [vmem:[%s858_s1 + $0x18] sm:$0xff]  ;;  %v601_v5 = vld [vmem:[%s858_s1 + $0x10] sm:$0xff] }
   0x3   :  { %v600_v6 = vld [vmem:[%s858_s1 + $0x8] sm:$0xff]  ;;  %v599_v7 = vld [vmem:[%s858_s1] sm:$0xff]  ;;  %v597_v12 = vld [vmem:[%s859_s0 + $0x30] sm:$0xff] }
   0x4   :  { %v595_v8 = vld [vmem:[%s859_s0 + $0x20] sm:$0xff]  ;;  %v596_v10 = vld [vmem:[%s859_s0 + $0x28] sm:$0xff]  ;;  %v593_v13 = vld [vmem:[%s859_s0 + $0x10] sm:$0xff] }
   0x5   :  { %v591_v9 = vld [vmem:[%s859_s0] sm:$0xff]  ;;  %v592_v11 = vld [vmem:[%s859_s0 + $0x8] sm:$0xff]  ;;  %v598_v14 = vld [vmem:[%s859_s0 + $0x38] sm:$0xff] }
   0x6   :  { %718 = vmatpush.bf16.msra.mxu2 %v605_v1  ;;  %150 = vmatpush.bf16.msra.mxu0 %v605_v1  ;;  %v594_v15 = vld [vmem:[%s859_s0 + $0x18] sm:$0xff]  ;;  %v607_v48 = vld [vmem:[%s861_s2] sm:$0xff]  ;;  %v608_v50 = vld [vmem:[%s861_s2 + $0x8] sm:$0xff] }
   0x7   :  { %v611_v49 = vld [vmem:[%s861_s2 + $0x20] sm:$0xff]  ;;  %v612_v51 = vld [vmem:[%s861_s2 + $0x28] sm:$0xff]  ;;  %v609_v52 = vld [vmem:[%s861_s2 + $0x10] sm:$0xff] }
   0x8   :  { %v613_v53 = vld [vmem:[%s861_s2 + $0x30] sm:$0xff]  ;;  %v610_v54 = vld [vmem:[%s861_s2 + $0x18] sm:$0xff]  ;;  %v733_v57 = vld [vmem:[%s860_s3] ss:$0 sm:$0xff] }
   0x9   :  { %v614_v55 = vld [vmem:[%s861_s2 + $0x38] sm:$0xff] }
   0xa   :  { %719 = vmatpush.bf16.msra.mxu2 %v604_v2  ;;  %151 = vmatpush.bf16.msra.mxu0 %v604_v2 }
   0xe   :  { %720 = vmatpush.bf16.msra.mxu2 %v603_v3  ;;  %152 = vmatpush.bf16.msra.mxu0 %v603_v3 }
  0x12   :  { %721 = vmatpush.bf16.msra.mxu2 %v602_v4  ;;  %153 = vmatpush.bf16.msra.mxu0 %v602_v4 }
  0x16   :  { %722 = vmatpush.bf16.msra.mxu2 %v601_v5  ;;  %154 = vmatpush.bf16.msra.mxu0 %v601_v5 }
  0x1a   :  { %723 = vmatpush.bf16.msra.mxu2 %v600_v6  ;;  %155 = vmatpush.bf16.msra.mxu0 %v600_v6 }
  0x1e   :  { %724 = vmatpush.bf16.msra.mxu2 %v599_v7  ;;  %156 = vmatpush.bf16.msra.mxu0 %v599_v7 }
  0x21   :  { %177 = vmatmul.bf16.vlgmr.msra.gmra.mxu2 %v595_v8  ;;  %157 = vmatmul.bf16.vlgmr.msra.gmra.mxu0 %v591_v9 }
  0x31   :  { %182 = vmatmul.bf16.gmra.mxu2 %v596_v10  ;;  %162 = vmatmul.bf16.gmra.mxu0 %v592_v11 }
  0x41   :  { %187 = vmatmul.bf16.gmra.mxu2 %v597_v12  ;;  %167 = vmatmul.bf16.gmra.mxu0 %v593_v13 }
  0x51   :  { %192 = vmatmul.bf16.gmra.mxu2 %v598_v14  ;;  %172 = vmatmul.bf16.gmra.mxu0 %v594_v15 }
  0x9e   :  { %v158_v16 = vpop.f32.mrf.mxu0 }
  0xa4   :  { %v178_v17 = vpop.f32.mrf.mxu2 }
  0xa6   :  { %v160_v18 = vpop.f32.mrf.mxu0 }
  0xa7   :  { %v626_v19 = vpack.c.bf16 %v160_v18, %v158_v16 }
  0xa9   :  { %627 = vst [vmem:[#allocation2 + $0x30] sm:$0xff] %v626_v19  }
  0xac   :  { %v180_v20 = vpop.f32.mrf.mxu2 }
  0xad   :  { %v646_v21 = vpack.c.bf16 %v180_v20, %v178_v17 }
  0xae   :  { %v163_v22 = vpop.f32.mrf.mxu0 }
  0xaf   :  { %706 = vst [vmem:[#allocation2 + $0x8] sm:$0xff] %v646_v21  }
  0xb0   :  { %v615_v47 = vld [vmem:[#allocation2 + $0x30] sm:$0xff] }
  0xb4   :  { %v183_v23 = vpop.f32.mrf.mxu2 }
  0xb6   :  { %v165_v24 = vpop.f32.mrf.mxu0  ;;  %v619_v43 = vld [vmem:[#allocation2 + $0x8] sm:$0xff] }
  0xb7   :  { %v631_v25 = vpack.c.bf16 %v165_v24, %v163_v22 }
  0xb9   :  { %703 = vst [vmem:[#allocation2] sm:$0xff] %v631_v25  }
  0xbc   :  { %v185_v26 = vpop.f32.mrf.mxu2 }
  0xbd   :  { %v651_v27 = vpack.c.bf16 %v185_v26, %v183_v23 }
  0xbe   :  { %v168_v28 = vpop.f32.mrf.mxu0 }
  0xbf   :  { %707 = vst [vmem:[#allocation2 + $0x20] sm:$0xff] %v651_v27  }
  0xc0   :  { %v616_v46 = vld [vmem:[#allocation2] sm:$0xff] }
  0xc4   :  { %v188_v29 = vpop.f32.mrf.mxu2 }
  0xc6   :  { %v170_v30 = vpop.f32.mrf.mxu0  ;;  %v620_v42 = vld [vmem:[#allocation2 + $0x20] sm:$0xff] }
  0xc7   :  { %v636_v31 = vpack.c.bf16 %v170_v30, %v168_v28 }
  0xc9   :  { %704 = vst [vmem:[#allocation2 + $0x18] sm:$0xff] %v636_v31  }
  0xcc   :  { %v190_v32 = vpop.f32.mrf.mxu2 }
  0xcd   :  { %v656_v33 = vpack.c.bf16 %v190_v32, %v188_v29 }
  0xce   :  { %v173_v34 = vpop.f32.mrf.mxu0 }
  0xcf   :  { %708 = vst [vmem:[#allocation2 + $0x28] sm:$0xff] %v656_v33  }
  0xd0   :  { %v617_v45 = vld [vmem:[#allocation2 + $0x18] sm:$0xff] }
  0xd4   :  { %v193_v35 = vpop.f32.mrf.mxu2 }
  0xd6   :  { %v175_v36 = vpop.f32.mrf.mxu0  ;;  %v621_v41 = vld [vmem:[#allocation2 + $0x28] sm:$0xff] }
  0xd7   :  { %v641_v37 = vpack.c.bf16 %v175_v36, %v173_v34 }
  0xd9   :  { %705 = vst [vmem:[#allocation2 + $0x10] sm:$0xff] %v641_v37  }
  0xdc   :  { %v195_v38 = vpop.f32.mrf.mxu2 }
  0xdd   :  { %v661_v39 = vpack.c.bf16 %v195_v38, %v193_v35 }
  0xdf   :  { %709 = vst [vmem:[#allocation2 + $0x38] sm:$0xff] %v661_v39  }
  0xe0   :  { %v618_v44 = vld [vmem:[#allocation2 + $0x10] sm:$0xff] }
  0xe6   :  { %v622_v40 = vld [vmem:[#allocation2 + $0x38] sm:$0xff] }
  0xe7   :  { %362 = vmatpush.bf16.msra.mxu1 %v622_v40  ;;  %725 = vmatpush.bf16.msra.mxu3 %v622_v40 }
  0xeb   :  { %363 = vmatpush.bf16.msra.mxu1 %v621_v41  ;;  %726 = vmatpush.bf16.msra.mxu3 %v621_v41 }
  0xef   :  { %364 = vmatpush.bf16.msra.mxu1 %v620_v42  ;;  %727 = vmatpush.bf16.msra.mxu3 %v620_v42 }
  0xf3   :  { %365 = vmatpush.bf16.msra.mxu1 %v619_v43  ;;  %728 = vmatpush.bf16.msra.mxu3 %v619_v43 }
  0xf7   :  { %366 = vmatpush.bf16.msra.mxu1 %v618_v44  ;;  %729 = vmatpush.bf16.msra.mxu3 %v618_v44 }
  0xfb   :  { %367 = vmatpush.bf16.msra.mxu1 %v617_v45  ;;  %730 = vmatpush.bf16.msra.mxu3 %v617_v45 }
  0xff   :  { %368 = vmatpush.bf16.msra.mxu1 %v616_v46  ;;  %731 = vmatpush.bf16.msra.mxu3 %v616_v46 }
 0x103   :  { %369 = vmatpush.bf16.msra.mxu1 %v615_v47  ;;  %732 = vmatpush.bf16.msra.mxu3 %v615_v47 }
 0x106   :  { %370 = vmatmul.bf16.vlgmr.msra.gmra.mxu1 %v607_v48  ;;  %390 = vmatmul.bf16.vlgmr.msra.gmra.mxu3 %v611_v49 }
 0x116   :  { %375 = vmatmul.bf16.gmra.mxu1 %v608_v50  ;;  %395 = vmatmul.bf16.gmra.mxu3 %v612_v51 }
 0x126   :  { %380 = vmatmul.bf16.gmra.mxu1 %v609_v52  ;;  %400 = vmatmul.bf16.gmra.mxu3 %v613_v53 }
 0x136   :  { %385 = vmatmul.bf16.gmra.mxu1 %v610_v54  ;;  %405 = vmatmul.bf16.gmra.mxu3 %v614_v55 }
 0x183   :  { %v371_v56 = vpop.f32.mrf.mxu1 }
 0x184   :  { %v372_v59 = vadd.f32 %v733_v57, %v371_v56 }
 0x186   :  { %v411_v62 = vmax.f32 %v372_v59, 0.0 }
 0x189   :  { %v391_v58 = vpop.f32.mrf.mxu3 }
 0x18a   :  { %v392_v0 = vadd.f32 %v733_v57, %v391_v58 }
 0x18b   :  { %v373_v60 = vpop.f32.mrf.mxu1 }
 0x18c   :  { %v374_v61 = vadd.f32 %v733_v57, %v373_v60  ;;  %v419_v5 = vmax.f32 %v392_v0, 0.0 }
 0x18e   :  { %v412_v63 = vmax.f32 %v374_v61, 0.0 }
 0x190   :  { %v666_v1 = vpack.c.bf16 %v412_v63, %v411_v62 }
 0x191   :  { %v393_v2 = vpop.f32.mrf.mxu3 }
 0x192   :  { %667 = vst [vmem:[%s862_s4] sm:$0xff] %v666_v1   ;;  %v394_v3 = vadd.f32 %v733_v57, %v393_v2 }
 0x193   :  { %v376_v4 = vpop.f32.mrf.mxu1 }
 0x194   :  { %v420_v6 = vmax.f32 %v394_v3, 0.0  ;;  %v377_v9 = vadd.f32 %v733_v57, %v376_v4 }
 0x196   :  { %v686_v7 = vpack.c.bf16 %v420_v6, %v419_v5  ;;  %v413_v12 = vmax.f32 %v377_v9, 0.0 }
 0x198   :  { %713 = vst [vmem:[%s862_s4 + $0x20] sm:$0xff] %v686_v7  }
 0x199   :  { %v396_v8 = vpop.f32.mrf.mxu3 }
 0x19a   :  { %v397_v14 = vadd.f32 %v733_v57, %v396_v8 }
 0x19b   :  { %v378_v10 = vpop.f32.mrf.mxu1 }
 0x19c   :  { %v379_v11 = vadd.f32 %v733_v57, %v378_v10  ;;  %v421_v19 = vmax.f32 %v397_v14, 0.0 }
 0x19e   :  { %v414_v13 = vmax.f32 %v379_v11, 0.0 }
 0x1a0   :  { %v671_v15 = vpack.c.bf16 %v414_v13, %v413_v12 }
 0x1a1   :  { %v398_v16 = vpop.f32.mrf.mxu3 }
 0x1a2   :  { %710 = vst [vmem:[%s862_s4 + $0x8] sm:$0xff] %v671_v15   ;;  %v399_v17 = vadd.f32 %v733_v57, %v398_v16 }
 0x1a3   :  { %v381_v18 = vpop.f32.mrf.mxu1 }
 0x1a4   :  { %v422_v20 = vmax.f32 %v399_v17, 0.0  ;;  %v382_v23 = vadd.f32 %v733_v57, %v381_v18 }
 0x1a6   :  { %v691_v21 = vpack.c.bf16 %v422_v20, %v421_v19  ;;  %v415_v26 = vmax.f32 %v382_v23, 0.0 }
 0x1a8   :  { %714 = vst [vmem:[%s862_s4 + $0x28] sm:$0xff] %v691_v21  }
 0x1a9   :  { %v401_v22 = vpop.f32.mrf.mxu3 }
 0x1aa   :  { %v402_v28 = vadd.f32 %v733_v57, %v401_v22 }
 0x1ab   :  { %v383_v24 = vpop.f32.mrf.mxu1 }
 0x1ac   :  { %v384_v25 = vadd.f32 %v733_v57, %v383_v24  ;;  %v423_v33 = vmax.f32 %v402_v28, 0.0 }
 0x1ae   :  { %v416_v27 = vmax.f32 %v384_v25, 0.0 }
 0x1b0   :  { %v676_v29 = vpack.c.bf16 %v416_v27, %v415_v26 }
 0x1b1   :  { %v403_v30 = vpop.f32.mrf.mxu3 }
 0x1b2   :  { %711 = vst [vmem:[%s862_s4 + $0x10] sm:$0xff] %v676_v29   ;;  %v404_v31 = vadd.f32 %v733_v57, %v403_v30 }
 0x1b3   :  { %v386_v32 = vpop.f32.mrf.mxu1 }
 0x1b4   :  { %v424_v34 = vmax.f32 %v404_v31, 0.0  ;;  %v387_v37 = vadd.f32 %v733_v57, %v386_v32 }
 0x1b6   :  { %v696_v35 = vpack.c.bf16 %v424_v34, %v423_v33  ;;  %v417_v40 = vmax.f32 %v387_v37, 0.0 }
 0x1b8   :  { %715 = vst [vmem:[%s862_s4 + $0x30] sm:$0xff] %v696_v35  }
 0x1b9   :  { %v406_v36 = vpop.f32.mrf.mxu3 }
 0x1ba   :  { %v407_v42 = vadd.f32 %v733_v57, %v406_v36 }
 0x1bb   :  { %v388_v38 = vpop.f32.mrf.mxu1 }
 0x1bc   :  { %v389_v39 = vadd.f32 %v733_v57, %v388_v38  ;;  %v425_v46 = vmax.f32 %v407_v42, 0.0 }
 0x1be   :  { %v418_v41 = vmax.f32 %v389_v39, 0.0 }
 0x1c0   :  { %v681_v43 = vpack.c.bf16 %v418_v41, %v417_v40 }
 0x1c1   :  { %v408_v44 = vpop.f32.mrf.mxu3 }
 0x1c2   :  { %712 = vst [vmem:[%s862_s4 + $0x18] sm:$0xff] %v681_v43   ;;  %v409_v45 = vadd.f32 %v733_v57, %v408_v44 }
 0x1c4   :  { %v426_v47 = vmax.f32 %v409_v45, 0.0 }
 0x1c6   :  { %v701_v48 = vpack.c.bf16 %v426_v47, %v425_v46 }
 0x1c8   :  { %716 = vst [vmem:[%s862_s4 + $0x38] sm:$0xff] %v701_v48  }

// kernel: gnn_forward.5
= control target key start
LH: loop header
LB: loop body
LE: loop exit
PB: predicated region body
PF: predicated region fallthrough
CT: control target
= control target key end

     0   :  { %s803_s1 = inlined_call_operand.vmem [shape: bf16[128,128], index: 1, kind: input, shape index: {}]   ;;  %s804_s0 = inlined_call_operand.vmem [shape: bf16[128,128], index: 0, kind: input, shape index: {}]   ;;  %s805_s3 = inlined_call_operand.vmem [shape: f32[1,128], index: 3, kind: input, shape index: {}]   ;;  %s806_s2 = inlined_call_operand.vmem [shape: bf16[128,128], index: 2, kind: input, shape index: {}]   ;;  %s807_s4 = inlined_call_operand.vmem [shape: f32[128,128], index: 4, kind: output, shape index: {}]  }
   0x1   :  { %v574_v0 = vld [vmem:[%s803_s1 + $0x38] sm:$0xff]  ;;  %v573_v1 = vld [vmem:[%s803_s1 + $0x30] sm:$0xff]  ;;  %v572_v2 = vld [vmem:[%s803_s1 + $0x28] sm:$0xff] }
   0x2   :  { %638 = vmatpush.bf16.msra.mxu2 %v574_v0  ;;  %149 = vmatpush.bf16.msra.mxu0 %v574_v0  ;;  %v571_v3 = vld [vmem:[%s803_s1 + $0x20] sm:$0xff]  ;;  %v570_v4 = vld [vmem:[%s803_s1 + $0x18] sm:$0xff]  ;;  %v569_v5 = vld [vmem:[%s803_s1 + $0x10] sm:$0xff] }
   0x3   :  { %v568_v6 = vld [vmem:[%s803_s1 + $0x8] sm:$0xff]  ;;  %v567_v7 = vld [vmem:[%s803_s1] sm:$0xff]  ;;  %v565_v12 = vld [vmem:[%s804_s0 + $0x30] sm:$0xff] }
   0x4   :  { %v563_v8 = vld [vmem:[%s804_s0 + $0x20] sm:$0xff]  ;;  %v564_v10 = vld [vmem:[%s804_s0 + $0x28] sm:$0xff]  ;;  %v561_v13 = vld [vmem:[%s804_s0 + $0x10] sm:$0xff] }
   0x5   :  { %v559_v9 = vld [vmem:[%s804_s0] sm:$0xff]  ;;  %v560_v11 = vld [vmem:[%s804_s0 + $0x8] sm:$0xff]  ;;  %v566_v14 = vld [vmem:[%s804_s0 + $0x38] sm:$0xff] }
   0x6   :  { %639 = vmatpush.bf16.msra.mxu2 %v573_v1  ;;  %150 = vmatpush.bf16.msra.mxu0 %v573_v1  ;;  %v562_v15 = vld [vmem:[%s804_s0 + $0x18] sm:$0xff]  ;;  %v575_v48 = vld [vmem:[%s806_s2] sm:$0xff]  ;;  %v576_v50 = vld [vmem:[%s806_s2 + $0x8] sm:$0xff] }
   0x7   :  { %v579_v49 = vld [vmem:[%s806_s2 + $0x20] sm:$0xff]  ;;  %v580_v51 = vld [vmem:[%s806_s2 + $0x28] sm:$0xff]  ;;  %v577_v52 = vld [vmem:[%s806_s2 + $0x10] sm:$0xff] }
   0x8   :  { %v581_v53 = vld [vmem:[%s806_s2 + $0x30] sm:$0xff]  ;;  %v578_v54 = vld [vmem:[%s806_s2 + $0x18] sm:$0xff]  ;;  %v654_v56 = vld [vmem:[%s805_s3] ss:$0 sm:$0xff] }
   0x9   :  { %v582_v55 = vld [vmem:[%s806_s2 + $0x38] sm:$0xff] }
   0xa   :  { %640 = vmatpush.bf16.msra.mxu2 %v572_v2  ;;  %151 = vmatpush.bf16.msra.mxu0 %v572_v2 }
   0xe   :  { %641 = vmatpush.bf16.msra.mxu2 %v571_v3  ;;  %152 = vmatpush.bf16.msra.mxu0 %v571_v3 }
  0x12   :  { %642 = vmatpush.bf16.msra.mxu2 %v570_v4  ;;  %153 = vmatpush.bf16.msra.mxu0 %v570_v4 }
  0x16   :  { %643 = vmatpush.bf16.msra.mxu2 %v569_v5  ;;  %154 = vmatpush.bf16.msra.mxu0 %v569_v5 }
  0x1a   :  { %644 = vmatpush.bf16.msra.mxu2 %v568_v6  ;;  %155 = vmatpush.bf16.msra.mxu0 %v568_v6 }
  0x1e   :  { %645 = vmatpush.bf16.msra.mxu2 %v567_v7  ;;  %156 = vmatpush.bf16.msra.mxu0 %v567_v7 }
  0x21   :  { %177 = vmatmul.bf16.vlgmr.msra.gmra.mxu2 %v563_v8  ;;  %157 = vmatmul.bf16.vlgmr.msra.gmra.mxu0 %v559_v9 }
  0x31   :  { %182 = vmatmul.bf16.gmra.mxu2 %v564_v10  ;;  %162 = vmatmul.bf16.gmra.mxu0 %v560_v11 }
  0x41   :  { %187 = vmatmul.bf16.gmra.mxu2 %v565_v12  ;;  %167 = vmatmul.bf16.gmra.mxu0 %v561_v13 }
  0x51   :  { %192 = vmatmul.bf16.gmra.mxu2 %v566_v14  ;;  %172 = vmatmul.bf16.gmra.mxu0 %v562_v15 }
  0x9e   :  { %v158_v16 = vpop.f32.mrf.mxu0 }
  0xa4   :  { %v178_v17 = vpop.f32.mrf.mxu2 }
  0xa6   :  { %v160_v18 = vpop.f32.mrf.mxu0 }
  0xa7   :  { %v594_v19 = vpack.c.bf16 %v160_v18, %v158_v16 }
  0xa9   :  { %595 = vst [vmem:[#allocation2 + $0x30] sm:$0xff] %v594_v19  }
  0xac   :  { %v180_v20 = vpop.f32.mrf.mxu2 }
  0xad   :  { %v614_v21 = vpack.c.bf16 %v180_v20, %v178_v17 }
  0xae   :  { %v163_v22 = vpop.f32.mrf.mxu0 }
  0xaf   :  { %634 = vst [vmem:[#allocation2 + $0x8] sm:$0xff] %v614_v21  }
  0xb0   :  { %v583_v47 = vld [vmem:[#allocation2 + $0x30] sm:$0xff] }
  0xb4   :  { %v183_v23 = vpop.f32.mrf.mxu2 }
  0xb6   :  { %v165_v24 = vpop.f32.mrf.mxu0  ;;  %v587_v43 = vld [vmem:[#allocation2 + $0x8] sm:$0xff] }
  0xb7   :  { %v599_v25 = vpack.c.bf16 %v165_v24, %v163_v22 }
  0xb9   :  { %631 = vst [vmem:[#allocation2] sm:$0xff] %v599_v25  }
  0xbc   :  { %v185_v26 = vpop.f32.mrf.mxu2 }
  0xbd   :  { %v619_v27 = vpack.c.bf16 %v185_v26, %v183_v23 }
  0xbe   :  { %v168_v28 = vpop.f32.mrf.mxu0 }
  0xbf   :  { %635 = vst [vmem:[#allocation2 + $0x20] sm:$0xff] %v619_v27  }
  0xc0   :  { %v584_v46 = vld [vmem:[#allocation2] sm:$0xff] }
  0xc4   :  { %v188_v29 = vpop.f32.mrf.mxu2 }
  0xc6   :  { %v170_v30 = vpop.f32.mrf.mxu0  ;;  %v588_v42 = vld [vmem:[#allocation2 + $0x20] sm:$0xff] }
  0xc7   :  { %v604_v31 = vpack.c.bf16 %v170_v30, %v168_v28 }
  0xc9   :  { %632 = vst [vmem:[#allocation2 + $0x18] sm:$0xff] %v604_v31  }
  0xcc   :  { %v190_v32 = vpop.f32.mrf.mxu2 }
  0xcd   :  { %v624_v33 = vpack.c.bf16 %v190_v32, %v188_v29 }
  0xce   :  { %v173_v34 = vpop.f32.mrf.mxu0 }
  0xcf   :  { %636 = vst [vmem:[#allocation2 + $0x28] sm:$0xff] %v624_v33  }
  0xd0   :  { %v585_v45 = vld [vmem:[#allocation2 + $0x18] sm:$0xff] }
  0xd4   :  { %v193_v35 = vpop.f32.mrf.mxu2 }
  0xd6   :  { %v175_v36 = vpop.f32.mrf.mxu0  ;;  %v589_v41 = vld [vmem:[#allocation2 + $0x28] sm:$0xff] }
  0xd7   :  { %v609_v37 = vpack.c.bf16 %v175_v36, %v173_v34 }
  0xd9   :  { %633 = vst [vmem:[#allocation2 + $0x10] sm:$0xff] %v609_v37  }
  0xdc   :  { %v195_v38 = vpop.f32.mrf.mxu2 }
  0xdd   :  { %v629_v39 = vpack.c.bf16 %v195_v38, %v193_v35 }
  0xdf   :  { %637 = vst [vmem:[#allocation2 + $0x38] sm:$0xff] %v629_v39  }
  0xe0   :  { %v586_v44 = vld [vmem:[#allocation2 + $0x10] sm:$0xff] }
  0xe6   :  { %v590_v40 = vld [vmem:[#allocation2 + $0x38] sm:$0xff] }
  0xe7   :  { %362 = vmatpush.bf16.msra.mxu1 %v590_v40  ;;  %646 = vmatpush.bf16.msra.mxu3 %v590_v40 }
  0xeb   :  { %363 = vmatpush.bf16.msra.mxu1 %v589_v41  ;;  %647 = vmatpush.bf16.msra.mxu3 %v589_v41 }
  0xef   :  { %364 = vmatpush.bf16.msra.mxu1 %v588_v42  ;;  %648 = vmatpush.bf16.msra.mxu3 %v588_v42 }
  0xf3   :  { %365 = vmatpush.bf16.msra.mxu1 %v587_v43  ;;  %649 = vmatpush.bf16.msra.mxu3 %v587_v43 }
  0xf7   :  { %366 = vmatpush.bf16.msra.mxu1 %v586_v44  ;;  %650 = vmatpush.bf16.msra.mxu3 %v586_v44 }
  0xfb   :  { %367 = vmatpush.bf16.msra.mxu1 %v585_v45  ;;  %651 = vmatpush.bf16.msra.mxu3 %v585_v45 }
  0xff   :  { %368 = vmatpush.bf16.msra.mxu1 %v584_v46  ;;  %652 = vmatpush.bf16.msra.mxu3 %v584_v46 }
 0x103   :  { %369 = vmatpush.bf16.msra.mxu1 %v583_v47  ;;  %653 = vmatpush.bf16.msra.mxu3 %v583_v47 }
 0x106   :  { %370 = vmatmul.bf16.vlgmr.msra.gmra.mxu1 %v575_v48  ;;  %390 = vmatmul.bf16.vlgmr.msra.gmra.mxu3 %v579_v49 }
 0x116   :  { %375 = vmatmul.bf16.gmra.mxu1 %v576_v50  ;;  %395 = vmatmul.bf16.gmra.mxu3 %v580_v51 }
 0x126   :  { %380 = vmatmul.bf16.gmra.mxu1 %v577_v52  ;;  %400 = vmatmul.bf16.gmra.mxu3 %v581_v53 }
 0x136   :  { %385 = vmatmul.bf16.gmra.mxu1 %v578_v54  ;;  %405 = vmatmul.bf16.gmra.mxu3 %v582_v55 }
 0x183   :  { %v371_v57 = vpop.f32.mrf.mxu1 }
 0x184   :  { %v372_v58 = vadd.f32 %v654_v56, %v371_v57 }
 0x186   :  { %411 = vst [vmem:[%s807_s4] sm:$0xff] %v372_v58 }
 0x189   :  { %v391_v59 = vpop.f32.mrf.mxu3 }
 0x18a   :  { %v392_v60 = vadd.f32 %v654_v56, %v391_v59 }
 0x18b   :  { %v373_v61 = vpop.f32.mrf.mxu1 }
 0x18c   :  { %419 = vst [vmem:[%s807_s4 + $0x40] sm:$0xff] %v392_v60  ;;  %v374_v62 = vadd.f32 %v654_v56, %v373_v61 }
 0x18e   :  { %412 = vst [vmem:[%s807_s4 + $0x8] sm:$0xff] %v374_v62 }
 0x191   :  { %v393_v63 = vpop.f32.mrf.mxu3 }
 0x192   :  { %v394_v0 = vadd.f32 %v654_v56, %v393_v63 }
 0x193   :  { %v376_v1 = vpop.f32.mrf.mxu1 }
 0x194   :  { %420 = vst [vmem:[%s807_s4 + $0x48] sm:$0xff] %v394_v0  ;;  %v377_v2 = vadd.f32 %v654_v56, %v376_v1 }
 0x196   :  { %413 = vst [vmem:[%s807_s4 + $0x10] sm:$0xff] %v377_v2 }
 0x199   :  { %v396_v3 = vpop.f32.mrf.mxu3 }
 0x19a   :  { %v397_v4 = vadd.f32 %v654_v56, %v396_v3 }
 0x19b   :  { %v378_v5 = vpop.f32.mrf.mxu1 }
 0x19c   :  { %421 = vst [vmem:[%s807_s4 + $0x50] sm:$0xff] %v397_v4  ;;  %v379_v6 = vadd.f32 %v654_v56, %v378_v5 }
 0x19e   :  { %414 = vst [vmem:[%s807_s4 + $0x18] sm:$0xff] %v379_v6 }
 0x1a1   :  { %v398_v7 = vpop.f32.mrf.mxu3 }
 0x1a2   :  { %v399_v8 = vadd.f32 %v654_v56, %v398_v7 }
 0x1a3   :  { %v381_v9 = vpop.f32.mrf.mxu1 }
 0x1a4   :  { %422 = vst [vmem:[%s807_s4 + $0x58] sm:$0xff] %v399_v8  ;;  %v382_v10 = vadd.f32 %v654_v56, %v381_v9 }
 0x1a6   :  { %415 = vst [vmem:[%s807_s4 + $0x20] sm:$0xff] %v382_v10 }
 0x1a9   :  { %v401_v11 = vpop.f32.mrf.mxu3 }
 0x1aa   :  { %v402_v12 = vadd.f32 %v654_v56, %v401_v11 }
 0x1ab   :  { %v383_v13 = vpop.f32.mrf.mxu1 }
 0x1ac   :  { %423 = vst [vmem:[%s807_s4 + $0x60] sm:$0xff] %v402_v12  ;;  %v384_v14 = vadd.f32 %v654_v56, %v383_v13 }
 0x1ae   :  { %416 = vst [vmem:[%s807_s4 + $0x28] sm:$0xff] %v384_v14 }
 0x1b1   :  { %v403_v15 = vpop.f32.mrf.mxu3 }
 0x1b2   :  { %v404_v16 = vadd.f32 %v654_v56, %v403_v15 }
 0x1b3   :  { %v386_v17 = vpop.f32.mrf.mxu1 }
 0x1b4   :  { %424 = vst [vmem:[%s807_s4 + $0x68] sm:$0xff] %v404_v16  ;;  %v387_v18 = vadd.f32 %v654_v56, %v386_v17 }
 0x1b6   :  { %417 = vst [vmem:[%s807_s4 + $0x30] sm:$0xff] %v387_v18 }
 0x1b9   :  { %v406_v19 = vpop.f32.mrf.mxu3 }
 0x1ba   :  { %v407_v20 = vadd.f32 %v654_v56, %v406_v19 }
 0x1bb   :  { %v388_v21 = vpop.f32.mrf.mxu1 }
 0x1bc   :  { %425 = vst [vmem:[%s807_s4 + $0x70] sm:$0xff] %v407_v20  ;;  %v389_v22 = vadd.f32 %v654_v56, %v388_v21 }
 0x1be   :  { %418 = vst [vmem:[%s807_s4 + $0x38] sm:$0xff] %v389_v22 }
 0x1c1   :  { %v408_v23 = vpop.f32.mrf.mxu3 }
 0x1c2   :  { %v409_v24 = vadd.f32 %v654_v56, %v408_v23 }
 0x1c4   :  { %426 = vst [vmem:[%s807_s4 + $0x78] sm:$0xff] %v409_v24 }

</bundles_post_ra>
